<compile_context>
chip_gen: v5e
topology: v5e:2x2
jax: 0.10.0
libtpu: 0.0.40
codegen_flags: <defaults>
</compile_context>

<pallas_src>
import jax
import jax.numpy as jnp
from jax.experimental import pallas as pl
from jax.experimental.pallas import tpu as pltpu


def _relu_kernel(x_ref, o_ref):
    # Elementwise hot path: max(x, 0) on the whole VMEM tile (VPU work, hidden
    # under the HBM<->VMEM DMAs for this memory-bound kernel).
    o_ref[...] = jnp.maximum(x_ref[...], jnp.zeros((), dtype=x_ref.dtype))


def relu_pallas(x: jax.Array) -> jax.Array:
    """Applies ReLU elementwise. Accepts any shape/dtype; returns same shape/dtype."""
    orig_shape = x.shape
    dtype = x.dtype
    total = x.size

    # Zero-sized input: nothing to do (avoids a zero-division in grid math).
    if total == 0:
        return x

    itemsize = jnp.dtype(dtype).itemsize
    lane = 128
    # Native packed sublane multiple: 8 for 32-bit, 16 for bf16/f16, 32 for int8/fp8.
    sublane = max(8, 32 // max(1, itemsize))

    # ~8 MiB per block buffer: in+out double-buffered = 32 MiB, fits every
    # generation (v7x has 64 MiB physical VMEM) and halves the grid-step count
    # vs. 4 MiB blocks, which matters most on v7x's fast HBM.
    block_bytes = 8 << 20
    cap_rows = max(sublane, (block_bytes // (lane * itemsize)) // sublane * sublane)

    x_flat = jnp.ravel(x)
    needs_pad = (total % lane) != 0
    if needs_pad:
        # Misaligned tail: pad only up to the next multiple of 128 so the 2-D
        # lane-dense reshape is possible, then slice back afterwards.
        # TODO(synk): replace with scalar-prefetch element count + in-kernel
        # masked tail store to eliminate this extra wrapper-side HBM pass.
        padded_total = ((total + lane - 1) // lane) * lane
        x_flat = jnp.pad(x_flat, (0, padded_total - total))
    else:
        padded_total = total

    rows = padded_total // lane
    x2d = x_flat.reshape(rows, lane)

    if rows <= cap_rows:
        # Small input: a single block covering the full extent (no (8,128)
        # divisibility requirement when the block equals the array dims).
        tile_rows = rows
    else:
        # Large input: fixed big tile; the ragged grid lets Pallas clip/mask the
        # final partial block — no pad-to-tile-multiple, no trailing slice.
        tile_rows = cap_rows

    grid = (pl.cdiv(rows, tile_rows),)

    out2d = pl.pallas_call(
        _relu_kernel,
        out_shape=jax.ShapeDtypeStruct((rows, lane), dtype),
        grid_spec=pltpu.PrefetchScalarGridSpec(
            num_scalar_prefetch=0,
            grid=grid,
            in_specs=[pl.BlockSpec((tile_rows, lane), lambda i: (i, 0))],
            out_specs=pl.BlockSpec((tile_rows, lane), lambda i: (i, 0)),
        ),
        compiler_params=pltpu.CompilerParams(
            # Independent blocks: let the runtime shard grid steps across
            # TensorCores where available (v7x), harmless elsewhere.
            dimension_semantics=("parallel",),
            # 8 MiB blocks x 4 double-buffered slots = 32 MiB; 48 MiB gives
            # headroom on every generation (v5e scoped default is only 16 MiB,
            # v7x physical VMEM is 64 MiB).
            vmem_limit_bytes=48 << 20,
        ),
        cost_estimate=pl.CostEstimate(
            flops=total,
            transcendentals=0,
            bytes_accessed=2 * total * itemsize,
        ),
    )(x2d)

    if needs_pad:
        return out2d.reshape(-1)[:total].reshape(orig_shape)
    return out2d.reshape(orig_shape)


if __name__ == "__main__":
    # MyNetwork has no parameters (just nn.ReLU), so nothing to initialize.
    key = jax.random.PRNGKey(0)
    x = jax.random.normal(key, (2, 4, 16, 16), dtype=jnp.float32)  # NCHW

    y = relu_pallas(x)
    y = jax.block_until_ready(y)

    # Correctness check against the reference (torch ReLU == jnp.maximum(x, 0)).
    ref = jnp.maximum(x, 0.0)
    assert y.shape == x.shape and y.dtype == x.dtype
    assert jnp.array_equal(y, ref)

    print("KERNEL_OK")
</pallas_src>

<mosaic_0001>
module attributes {stable_mosaic.version = 11 : i64} {
  func.func @_relu_kernel(%arg0: i32, %arg1: memref<16x128xf32, #tpu.memory_space<vmem>>, %arg2: memref<16x128xf32, #tpu.memory_space<vmem>>) attributes {dimension_semantics = [#tpu.dimension_semantics<parallel>], iteration_bounds = array<i64: 1>, scalar_prefetch = 0 : i64, scratch_operands = 0 : i64, tpu.core_type = #tpu.core_type<tc>, window_params = [{transform_indices = @transform_0, window_bounds = array<i64: 16, 128>}, {transform_indices = @transform_1, window_bounds = array<i64: 16, 128>}]} {
    %c0 = arith.constant 0 : index
    %c0_0 = arith.constant 0 : index
    %0 = vector.load %arg1[%c0, %c0_0] : memref<16x128xf32, #tpu.memory_space<vmem>>, vector<16x128xf32>
    %cst = arith.constant 0.000000e+00 : f32
    %1 = vector.broadcast %cst : f32 to vector<16x128xf32>
    %2 = arith.maximumf %0, %1 : vector<16x128xf32>
    %c0_1 = arith.constant 0 : index
    %c0_2 = arith.constant 0 : index
    %3 = vector.load %arg2[%c0_1, %c0_2] : memref<16x128xf32, #tpu.memory_space<vmem>>, vector<16x128xf32>
    tpu.vector_store %arg2[%c0_1, %c0_2], %2 {strides = array<i32>} : memref<16x128xf32, #tpu.memory_space<vmem>>, vector<16x128xf32>,
    return
  }
  func.func @transform_0(%arg0: i32) -> (i32, i32) {
    %c0_i32 = arith.constant 0 : i32
    %c0_i32_0 = arith.constant 0 : i32
    return %arg0, %c0_i32 : i32, i32
  }
  func.func @transform_1(%arg0: i32) -> (i32, i32) {
    %c0_i32 = arith.constant 0 : i32
    %c0_i32_0 = arith.constant 0 : i32
    return %arg0, %c0_i32 : i32, i32
  }
}

</mosaic_0001>

<bundles_post_ra>
// kernel: tpu_custom_call.1
= control target key start
LH: loop header
LB: loop body
LE: loop exit
PB: predicated region body
PF: predicated region fallthrough
CT: control target
= control target key end

     0   :  { %6 = vsyncpa [#allocation3], 0  ;;  %s126_s0 = inlined_call_operand.hbm [shape: f32[16,128], index: 0, kind: input, shape index: {}]   ;;  %s127_s1 = inlined_call_operand.hbm [shape: f32[16,128], index: 1, kind: output, shape index: {}]  }
   0x1   :  { %7 = vsyncpa [#allocation4], 0  ;;  %s12_s8 = sshll.u32 %s126_s0, 4  ;;  %s106_s9 = smov [#allocation2]   ;;  %s13_s8 = int_to_ptr.hbm [resolvable:$true] %s12_s8 }
   0x2   :  { %s14_s10 = sshll.u32 %s106_s9, 4  ;;  %s107_s11 = smov 128   ;;  %s15_s10 = int_to_ptr.vmem [resolvable:$true] %s14_s10 }
   0x3   :  { %s108_s12 = smov 8  }
   0x4   :  { %20 = dma.hbm_to_vmem [thread:$0]  %s13_s8, 256, %s15_s10, [#allocation3], %s107_s11, %s107_s11, %s108_s12  }
   0x5   :  { %102 = dma.done.wait [#allocation3], 256  }
   0x6   :  { %103 = vsyncadd [#allocation3], 4294967040  ;;  %s109_s13 = smov [#allocation5]   ;;  %s37_s17 = sshll.u32 %s127_s1, 4  ;;  %v25_v0 = vld [vmem:[#allocation2] sm:$0xff]  ;;  %v26_v1 = vld [vmem:[#allocation2 + $0x8] sm:$0xff]  ;;  %s38_s17 = int_to_ptr.hbm [resolvable:$true] %s37_s17 }
   0x7   :  { %s35_s14 = sshll.u32 %s109_s13, 4  ;;  %v27_v2 = vmax.f32 %v25_v0, 0.0  ;;  %v28_v3 = vmax.f32 %v26_v1, 0.0  ;;  %s36_s14 = int_to_ptr.vmem [resolvable:$true] %s35_s14 }
   0x9   :  { %29 = vst [vmem:[#allocation5] sm:$0xff] %v27_v2 }
   0xa   :  { %30 = vst [vmem:[#allocation5 + $0x8] sm:$0xff] %v28_v3 }
   0xb   :  { %43 = dma.vmem_to_hbm [thread:$0]  %s36_s14, 256, %s38_s17, [#allocation4], %s107_s11, %s107_s11, %s108_s12  }
   0xc   :  { %104 = dma.done.wait [#allocation4], 256  }
   0xd   :  { %105 = vsyncadd [#allocation4], 4294967040 }
   0xe   :  { %48 = vsyncpa [#allocation3], 1 }
   0xf   :  { %49 = vsyncpa [#allocation4], 1 }

</bundles_post_ra>
